<compile_context>
chip_gen: v5e
topology: v5e:2x2
jax: 0.10.0
libtpu: 0.0.40
codegen_flags: <defaults>
</compile_context>

<pallas_src>
import math

import jax
import jax.numpy as jnp
from jax.experimental import pallas as pl
from jax.experimental.pallas import tpu as pltpu


def _expnorm_kernel(d_ref, rep_ref, const_ref, o_ref):
    # d_ref    : (tile_rows, per)  f32 distances, `per` packed per row
    # rep_ref  : (per, 128)        bf16 0/1 lane-replication matrix (MXU)
    # const_ref: (2, 128)          f32: row 0 = mu tiled, row 1 = -beta tiled
    # o_ref    : (tile_rows, 128)  packed output block (lane-dense stores);
    #            lane j holds rbf (j % n_rbf_pad) of distance row*per + j//n_rbf_pad
    f32 = jnp.float32
    e = jnp.exp(-d_ref[...])                       # (tile_rows, per), exp(-d)

    # Exact replication of each distance across its n_rbf lanes via the MXU:
    # split e into three exactly-bf16 pieces; bf16 * {0,1} with f32 accumulate
    # is exact, so e_rep reproduces e to <= 1 ulp independent of matmul precision.
    c1 = e.astype(jnp.bfloat16)
    r1 = e - c1.astype(f32)
    c2 = r1.astype(jnp.bfloat16)
    c3 = (r1 - c2.astype(f32)).astype(jnp.bfloat16)
    rep = rep_ref[...]
    e_rep = (jnp.dot(c1, rep, preferred_element_type=f32)
             + jnp.dot(c2, rep, preferred_element_type=f32)
             + jnp.dot(c3, rep, preferred_element_type=f32))   # (tile_rows, 128)

    mu = const_ref[0:1, :]                         # (1, 128)  mu tiled
    nbeta = const_ref[1:2, :]                      # (1, 128)  -beta tiled
    diff = e_rep - mu
    o_ref[...] = jnp.exp(nbeta * (diff * diff)).astype(o_ref.dtype)


def _round_up(x, m):
    return ((x + m - 1) // m) * m


def exp_normal_basis(dist, mu, beta, *, tile_rows=None, out_dtype=jnp.float32):
    """dist: float array of any shape; returns dist.shape + (n_rbf,) like the module."""
    orig_shape = dist.shape
    d = dist.reshape(-1).astype(jnp.float32)
    n = int(d.shape[0])
    n_rbf = int(mu.shape[0])

    # Pack `per` distances x n_rbf_pad RBFs into the 128-lane axis.
    n_rbf_pad = max(1, int(pl.next_power_of_2(n_rbf)))
    if n_rbf_pad > 128:
        # TODO(synk): tile the RBF axis for n_rbf > 128 (not needed for this module).
        raise NotImplementedError("n_rbf > 128 not supported by the packed layout")
    per = 128 // n_rbf_pad

    # Padded RBF columns (if any) use mu=0, beta=1: harmless values, sliced off.
    mu_p = jnp.pad(mu.astype(jnp.float32), (0, n_rbf_pad - n_rbf))
    nbeta_p = jnp.pad(-beta.astype(jnp.float32), (0, n_rbf_pad - n_rbf),
                      constant_values=-1.0)
    consts = jnp.stack([jnp.tile(mu_p, per), jnp.tile(nbeta_p, per)])     # (2, 128)

    lane_slot = jnp.arange(128, dtype=jnp.int32) // n_rbf_pad
    rep = (lane_slot[None, :] == jnp.arange(per, dtype=jnp.int32)[:, None])
    rep = rep.astype(jnp.bfloat16)                                        # (per, 128)

    total_rows = int(pl.cdiv(n, per))
    if tile_rows is None:
        # ~0.25-1 MiB output blocks for large N, but keep >= ~8 grid steps so
        # both v7x TensorCores get grid work and each core can pipeline.
        tile_rows = max(8, min(2048, _round_up(int(pl.cdiv(total_rows, 8)), 8)))
    num_tiles = int(pl.cdiv(total_rows, tile_rows))
    rows_pad = num_tiles * tile_rows
    n_pad = rows_pad * per
    if n_pad != n:
        d = jnp.pad(d, (0, n_pad - n))       # zero padding is benign (no 1/d here)
    d2 = d.reshape(rows_pad, per)

    out_packed = pl.pallas_call(
        _expnorm_kernel,
        out_shape=jax.ShapeDtypeStruct((rows_pad, 128), out_dtype),
        grid_spec=pltpu.PrefetchScalarGridSpec(
            num_scalar_prefetch=0,
            grid=(num_tiles,),
            in_specs=[
                pl.BlockSpec((tile_rows, per), lambda i: (i, 0)),
                pl.BlockSpec((per, 128), lambda i: (0, 0)),
                pl.BlockSpec((2, 128), lambda i: (0, 0)),
            ],
            out_specs=pl.BlockSpec((tile_rows, 128), lambda i: (i, 0)),
        ),
        compiler_params=pltpu.CompilerParams(
            dimension_semantics=("parallel",),   # shards grid steps across TCs
        ),
    )(d2, rep, consts)

    # Row-major (rows_pad, per*n_rbf_pad) == (n_pad, n_rbf_pad): free reshape,
    # no transpose, no extra HBM pass over the n_rbf x N slab.
    out = out_packed.reshape(n_pad, n_rbf_pad)[:n, :n_rbf]
    return out.reshape(*orig_shape, n_rbf)


def reference(dist, mu, beta):
    # Direct port of ExpNormalBasis.forward
    shape_d = dist[..., None]
    arg = beta * (jnp.exp(-shape_d) - mu) ** 2
    return jnp.exp(-arg)


if __name__ == "__main__":
    # Module hyperparameters (deterministic, in-script).  learnable_mu /
    # learnable_beta only affect trainability, not the forward math.
    n_rbf = 16
    cutoff = 5.0
    mu = jnp.linspace(math.exp(-cutoff), 1.0, n_rbf, dtype=jnp.float32)
    init_beta = (2.0 / n_rbf * (1.0 - math.exp(-cutoff))) ** (-2)
    beta = jnp.ones((n_rbf,), dtype=jnp.float32) * init_beta

    # Small deterministic input; 4000 is deliberately not a multiple of the
    # packing factor so the padding path is exercised.
    key = jax.random.PRNGKey(0)
    N = 4000
    dist = jax.random.uniform(key, (N,), dtype=jnp.float32,
                              minval=0.1, maxval=cutoff)

    out = exp_normal_basis(dist, mu, beta)
    out = jax.block_until_ready(out)

    ref = reference(dist, mu, beta)
    assert out.shape == (N, n_rbf)
    assert jnp.allclose(out, ref, atol=1e-5, rtol=1e-5), \
        float(jnp.max(jnp.abs(out - ref)))

    print("KERNEL_OK")
</pallas_src>

<mosaic_0001>
module attributes {stable_mosaic.version = 11 : i64} {
  func.func @_expnorm_kernel(%arg0: i32, %arg1: memref<64x8xf32, #tpu.memory_space<vmem>>, %arg2: memref<8x128xbf16, #tpu.memory_space<vmem>>, %arg3: memref<2x128xf32, #tpu.memory_space<vmem>>, %arg4: memref<64x128xf32, #tpu.memory_space<vmem>>) attributes {dimension_semantics = [#tpu.dimension_semantics<parallel>], iteration_bounds = array<i64: 8>, scalar_prefetch = 0 : i64, scratch_operands = 0 : i64, tpu.core_type = #tpu.core_type<tc>, window_params = [{transform_indices = @transform_0, window_bounds = array<i64: 64, 8>}, {pipeline_mode = #tpu.pipeline_mode<synchronous>, transform_indices = @transform_1, window_bounds = array<i64: 8, 128>}, {pipeline_mode = #tpu.pipeline_mode<synchronous>, transform_indices = @transform_2, window_bounds = array<i64: 2, 128>}, {transform_indices = @transform_3, window_bounds = array<i64: 64, 128>}]} {
    %c0 = arith.constant 0 : index
    %c0_0 = arith.constant 0 : index
    %0 = vector.load %arg1[%c0, %c0_0] : memref<64x8xf32, #tpu.memory_space<vmem>>, vector<64x8xf32>
    %cst = arith.constant 0.000000e+00 : f32
    %1 = vector.broadcast %cst : f32 to vector<64x8xf32>
    %2 = arith.subf %1, %0 : vector<64x8xf32>
    %3 = math.exp %2 : vector<64x8xf32>
    %4 = arith.truncf %3 : vector<64x8xf32> to vector<64x8xbf16>
    %5 = arith.extf %4 : vector<64x8xbf16> to vector<64x8xf32>
    %6 = arith.subf %3, %5 : vector<64x8xf32>
    %7 = arith.truncf %6 : vector<64x8xf32> to vector<64x8xbf16>
    %8 = arith.extf %7 : vector<64x8xbf16> to vector<64x8xf32>
    %9 = arith.subf %6, %8 : vector<64x8xf32>
    %10 = arith.truncf %9 : vector<64x8xf32> to vector<64x8xbf16>
    %c0_1 = arith.constant 0 : index
    %c0_2 = arith.constant 0 : index
    %11 = vector.load %arg2[%c0_1, %c0_2] : memref<8x128xbf16, #tpu.memory_space<vmem>>, vector<8x128xbf16>
    %cst_3 = arith.constant dense<0.000000e+00> : vector<64x128xf32>
    %12 = tpu.matmul %4, %11, %cst_3 {dimension_numbers = #tpu.dot_dimension_numbers<[1], [0], [0], [1], [0, 0, 1, 1], [], []>} : vector<64x8xbf16>, vector<8x128xbf16>, vector<64x128xf32> -> vector<64x128xf32>
    %cst_4 = arith.constant dense<0.000000e+00> : vector<64x128xf32>
    %13 = tpu.matmul %7, %11, %cst_4 {dimension_numbers = #tpu.dot_dimension_numbers<[1], [0], [0], [1], [0, 0, 1, 1], [], []>} : vector<64x8xbf16>, vector<8x128xbf16>, vector<64x128xf32> -> vector<64x128xf32>
    %14 = arith.addf %12, %13 : vector<64x128xf32>
    %cst_5 = arith.constant dense<0.000000e+00> : vector<64x128xf32>
    %15 = tpu.matmul %10, %11, %cst_5 {dimension_numbers = #tpu.dot_dimension_numbers<[1], [0], [0], [1], [0, 0, 1, 1], [], []>} : vector<64x8xbf16>, vector<8x128xbf16>, vector<64x128xf32> -> vector<64x128xf32>
    %16 = arith.addf %14, %15 : vector<64x128xf32>
    %c0_6 = arith.constant 0 : index
    %c0_7 = arith.constant 0 : index
    %17 = vector.load %arg3[%c0_6, %c0_7] : memref<2x128xf32, #tpu.memory_space<vmem>>, vector<1x128xf32>
    %c1 = arith.constant 1 : index
    %c0_8 = arith.constant 0 : index
    %18 = vector.load %arg3[%c1, %c0_8] : memref<2x128xf32, #tpu.memory_space<vmem>>, vector<1x128xf32>
    %19 = vector.broadcast %17 : vector<1x128xf32> to vector<64x128xf32>
    %20 = arith.subf %16, %19 : vector<64x128xf32>
    %21 = arith.mulf %20, %20 : vector<64x128xf32>
    %22 = vector.broadcast %18 : vector<1x128xf32> to vector<64x128xf32>
    %23 = arith.mulf %22, %21 : vector<64x128xf32>
    %24 = math.exp %23 : vector<64x128xf32>
    %c0_9 = arith.constant 0 : index
    %c0_10 = arith.constant 0 : index
    %25 = vector.load %arg4[%c0_9, %c0_10] : memref<64x128xf32, #tpu.memory_space<vmem>>, vector<64x128xf32>
    tpu.vector_store %arg4[%c0_9, %c0_10], %24 {strides = array<i32>} : memref<64x128xf32, #tpu.memory_space<vmem>>, vector<64x128xf32>,
    return
  }
  func.func @transform_0(%arg0: i32) -> (i32, i32) {
    %c0_i32 = arith.constant 0 : i32
    %c0_i32_0 = arith.constant 0 : i32
    return %arg0, %c0_i32 : i32, i32
  }
  func.func @transform_1(%arg0: i32) -> (i32, i32) {
    %c0_i32 = arith.constant 0 : i32
    %c0_i32_0 = arith.constant 0 : i32
    %c0_i32_1 = arith.constant 0 : i32
    return %c0_i32, %c0_i32_0 : i32, i32
  }
  func.func @transform_2(%arg0: i32) -> (i32, i32) {
    %c0_i32 = arith.constant 0 : i32
    %c0_i32_0 = arith.constant 0 : i32
    %c0_i32_1 = arith.constant 0 : i32
    return %c0_i32, %c0_i32_0 : i32, i32
  }
  func.func @transform_3(%arg0: i32) -> (i32, i32) {
    %c0_i32 = arith.constant 0 : i32
    %c0_i32_0 = arith.constant 0 : i32
    return %arg0, %c0_i32 : i32, i32
  }
}

</mosaic_0001>

<bundles_post_ra>
// kernel: tpu_custom_call.1
= control target key start
LH: loop header
LB: loop body
LE: loop exit
PB: predicated region body
PF: predicated region fallthrough
CT: control target
= control target key end

     0   :  { %8 = vsyncpa [#allocation3], 0  ;;  %s915_s0 = inlined_call_operand.vmem [shape: f32[512,8], index: 0, kind: input, shape index: {}]   ;;  %s916_s1 = inlined_call_operand.vmem [shape: bf16[8,128], index: 1, kind: input, shape index: {}]   ;;  %s917_s2 = inlined_call_operand.vmem [shape: f32[2,128], index: 2, kind: input, shape index: {}]   ;;  %s918_s3 = inlined_call_operand.hbm [shape: f32[512,128], index: 3, kind: output, shape index: {}]  }
   0x1   :  { %10 = vsyncpa [#allocation3 + $0x1], 0  ;;  %s753_s12 = smov 0   ;;  %s755_s13 = smov 0  }
   0x2   :  { %s757_s14 = smov 0   ;;  %s759_s15 = smov 0  }
   0x3 LB: > { %s774_s16 = sadd.s32 4294967295, %s729_s15   ;;  %s564_s17 = sadd.s32 4294967294, %s729_s15   ;;  %s729_s15 = sphi %s759_s15, %s924_s15   ;;  %s725_s14 = sphi %s757_s14, %s923_s14   ;;  %s721_s13 = sphi %s755_s13, %s922_s13   ;;  %s717_s12 = sphi %s753_s12, %s921_s12  }
   0x4   : > { %s778_s18 = sadd.s32 1, %s729_s15   ;;  %s91_s19 = sadd.s32 1, %s725_s14 }
   0x5   : > { %s88_s20 = ssub.s32 %s729_s15, %s778_s18  ;;  %p101_p0 = scmp.ne.s32.totalorder %s725_s14, %s721_s13 }
   0x6   : > { %p89_p1 = scmp.eq.s32.totalorder %s88_s20, 0  ;;  %p102_p2 = scmp.eq.s32.totalorder %s774_s16, 7 }
   0x7   : > { %p107_p3 = scmp.ne.s32.totalorder %s721_s13, %s717_s12  ;;  %p108_p4 = scmp.eq.s32.totalorder %s564_s17, 7 }
   0x8   : > { %s789_s21 = scalar_select %p89_p1, %s725_s14, %s91_s19  }
   0x9   : > { %p791_p5 = por %p102_p2, %p101_p0  ;;  %p795_p6 = por %p108_p4, %p107_p3 }
   0xa   : > { %p567_p7 = scmp.ge.s32.totalorder %s729_s15, 1  ;;  %p141_p8 = scmp.lt.s32.totalorder %s729_s15, 9 }
   0xc   : > { %p142_p9 = pnand %p567_p7, %p141_p8 }
   0xd   : > { %s569_s26 = sshll.u32 (!%p142_p9), %s774_s16, 3  ;;  %s162_s8 = sand.u32 (!%p142_p9), 1, %s721_s13  }
   0xe   : > { %145 = sbr.rel (%p142_p9) target bundleno = 242 (0xf2), region = 32  ;;  %p166_p10 = scmp.lt.s32.totalorder (!%p142_p9), %s569_s26, 63 }
   0xf   : > { %s568_s9 = sshll.u32 (!%p142_p9), %s162_s8, 6  ;;  %s588_s11 = sshll.u32 (!%p142_p9), %s774_s16, 6 }
  0x10   : > { %s859_s10 = scalar_lea.vmem (!%p142_p9), [#allocation2], %s568_s9  ;;  %s498_s20 = scalar_lea.hbm (!%p142_p9), %s918_s3, %s588_s11 }
  0x11   : > { %s499_s24 = sshll.u32 (!%p142_p9), %s859_s10, 4  ;;  %s501_s25 = sshll.u32 (!%p142_p9), %s498_s20, 4  ;;  %s500_s24 = int_to_ptr.vmem [resolvable:$true] %s499_s24  ;;  %s502_s25 = int_to_ptr.hbm [resolvable:$true] %s501_s25 }
  0x12   : > { %s487_s16 = scalar_lea.sflag (!%p142_p9), [#allocation3], %s162_s8 }
  0x13   : > { %v257_v0 = vld [vmem:[%s916_s1] sm:$0xf]  ;;  %vm291_vm0 = vcmask 1043456   ;;  %s926_s26 = smov (!%p166_p10, %s569_s26), 63  ;;  %vm278_vm1 = vcmask 64512  }
  0x14   : > { %v805_v1 = vsel %vm291_vm0, %v257_v0, 0  ;;  %s570_s27 = sshll.u32 %s926_s26, 3  ;;  %s681_s26 = sshra.s32 %s502_s25, 4  ;;  %s682_s26 = int_to_ptr.hbm [resolvable:$true] %s681_s26 }
  0x15   : > { %590 = vmatpush.bf16.msra.mxu1 %v805_v1  ;;  %302 = vmatpush.bf16.msra.mxu0 %v805_v1  ;;  %s169_s30 = scalar_lea.vmem %s915_s0, %s570_s27  ;;  %s683_s27 = scalar_lea.hbm %s682_s26, 64 }
  0x16   : > { %589 = vmatpush.bf16.msra.mxu3 %v805_v1  ;;  %591 = vmatpush.bf16.msra.mxu2 %v805_v1  ;;  %v175_v2 = vld [vmem:[%s169_s30 + $0x10] sm:$0xff]  ;;  %v176_v3 = vld [vmem:[%s169_s30 + $0x18] sm:$0xff]  ;;  %v173_v4 = vld [vmem:[%s169_s30] sm:$0xff]  ;;  %p684_p11 = scmp.ne.s32.totalorder %s682_s26, %s683_s27  ;;  %p688_p0 = scmp.lt.s32.totalorder %s682_s26, %s918_s3 }
  0x17   : > { %v183_v5 = vsub.f32 0.0, %v175_v2  ;;  %v184_v6 = vsub.f32 0.0, %v176_v3  ;;  %v174_v7 = vld [vmem:[%s169_s30 + $0x8] sm:$0xff]  ;;  %v181_v8 = vsub.f32 0.0, %v173_v4  ;;  %v177_v9 = vld [vmem:[%s169_s30 + $0x20] sm:$0xff]  ;;  %v179_v20 = vld [vmem:[%s169_s30 + $0x30] sm:$0xff] }
  0x18   : > { %v178_v10 = vld [vmem:[%s169_s30 + $0x28] sm:$0xff]  ;;  %v182_v11 = vsub.f32 0.0, %v174_v7  ;;  %v185_v12 = vsub.f32 0.0, %v177_v9  ;;  %v180_v22 = vld [vmem:[%s169_s30 + $0x38] sm:$0xff]  ;;  %v187_v25 = vsub.f32 0.0, %v179_v20  ;;  %p685_p12 = pnand %p684_p11, %p791_p5  ;;  %s687_s30 = scalar_lea.hbm %s918_s3, 512 }
  0x19   : > { %363 = vmatpush.bf16.msrb.mxu0 %v805_v1  ;;  %v186_v13 = vsub.f32 0.0, %v178_v10  ;;  %v193_v14 = vmul.f32 1.442695, %v183_v5  ;;  %v195_v15 = vmul.f32 1.442695, %v184_v6  ;;  %v188_v32 = vsub.f32 0.0, %v180_v22  ;;  %p689_p1 = scmp.lt.s32.totalorder %s687_s30, %s683_s27 }
  0x1a   : > { %v189_v16 = vmul.f32 1.442695, %v181_v8  ;;  %v191_v17 = vmul.f32 1.442695, %v182_v11  ;;  %v197_v18 = vmul.f32 1.442695, %v185_v12  ;;  %p686_p13 = pneg %p685_p12 }
  0x1b   : > { %635 = vpow2.f32 %v193_v14  ;;  %v199_v19 = vmul.f32 1.442695, %v186_v13  ;;  %v201_v41 = vmul.f32 1.442695, %v187_v25  ;;  %v203_v49 = vmul.f32 1.442695, %v188_v32  ;;  %p690_p2 = por %p689_p1, %p688_p0 }
  0x1c   : > { %637 = vpow2.f32 %v195_v15 }
  0x1d   : > { %639 = vpow2.f32 %v189_v16  ;;  %p691_p3 = pnand %p690_p2, %p686_p13 }
  0x1e   : > { %641 = vpow2.f32 %v191_v17 }
  0x1f   : > { %643 = vpow2.f32 %v197_v18 }
  0x20   : > { %645 = vpow2.f32 %v199_v19 }
  0x21   : > { %v636_v21 = vpop.eup %635  ;;  %647 = vpow2.f32 %v201_v41 }
  0x22   : > { %v638_v23 = vpop.eup %637  ;;  %v207_v24 = vpack.c.bf16 %v636_v21, %v636_v21  ;;  %649 = vpow2.f32 %v203_v49 }
  0x23   : > { %v640_v26 = vpop.eup %639  ;;  %v208_v27 = vpack.c.bf16 %v638_v23, %v638_v23 }
  0x24   : > { %v642_v28 = vpop.eup %641  ;;  %v215_v29 = vunpack.c.l.bf16 %v207_v24  ;;  %v334_v30 = vunpack.c.l.b16 %v207_v24  ;;  %v815_v31 = vpack.c.bf16 %v640_v26, %v640_v26 }
  0x25   : > { %v644_v33 = vpop.eup %643  ;;  %v216_v34 = vunpack.c.l.bf16 %v208_v27  ;;  %v335_v35 = vunpack.c.l.b16 %v208_v27  ;;  %v206_v36 = vpack.c.bf16 %v642_v28, %v642_v28 }
  0x26   : > { %v646_v37 = vpop.eup %645  ;;  %v213_v38 = vunpack.c.l.bf16 %v815_v31  ;;  %v223_v39 = vsub.f32 %v636_v21, %v215_v29  ;;  %v209_v40 = vpack.c.bf16 %v644_v33, %v644_v33  ;;  %v332_v18 = vunpack.c.l.b16 %v815_v31 }
  0x27   : > { %v341_v42 = vpack.c.b16 %v335_v35, %v334_v30  ;;  %v214_v43 = vunpack.c.l.bf16 %v206_v36  ;;  %v224_v44 = vsub.f32 %v638_v23, %v216_v34  ;;  %v210_v45 = vpack.c.bf16 %v646_v37, %v646_v37  ;;  %v648_v7 = vpop.eup %647 }
  0x28   : > { %v818_v46 = vsub.f32 %v640_v26, %v213_v38  ;;  %v231_v47 = vpack.c.bf16 %v223_v39, %v223_v39  ;;  %v217_v48 = vunpack.c.l.bf16 %v209_v40  ;;  %v336_v5 = vunpack.c.l.b16 %v209_v40  ;;  %v650_v10 = vpop.eup %649 }
  0x29   : > { %576 = vmatmul.msk.bf16.vlgmr.msra.gmra.mxu1 %vm278_vm1, %v341_v42  ;;  %v821_v50 = vsub.f32 %v642_v28, %v214_v43  ;;  %v232_v51 = vpack.c.bf16 %v224_v44, %v224_v44  ;;  %v218_v52 = vunpack.c.l.bf16 %v210_v45  ;;  %v337_v6 = vunpack.c.l.b16 %v210_v45 }
  0x2a   : > { %v229_v53 = vpack.c.bf16 %v818_v46, %v818_v46  ;;  %v268_v54 = vunpack.c.l.b16 %v231_v47  ;;  %v239_v55 = vunpack.c.l.bf16 %v231_v47  ;;  %v225_v61 = vsub.f32 %v644_v33, %v217_v48 }
  0x2b   : > { %v230_v56 = vpack.c.bf16 %v821_v50, %v821_v50  ;;  %v269_v57 = vunpack.c.l.b16 %v232_v51  ;;  %v240_v58 = vunpack.c.l.bf16 %v232_v51  ;;  %v226_v2 = vsub.f32 %v646_v37, %v218_v52 }
  0x2c   : > { %v266_v59 = vunpack.c.l.b16 %v229_v53  ;;  %v247_v60 = vsub.f32 %v223_v39, %v239_v55  ;;  %v233_v8 = vpack.c.bf16 %v225_v61, %v225_v61  ;;  %v342_v11 = vpack.c.b16 %v337_v6, %v336_v5 }
  0x2d   : > { %v267_v62 = vunpack.c.l.b16 %v230_v56  ;;  %v275_v63 = vpack.c.b16 %v269_v57, %v268_v54  ;;  %v248_v0 = vsub.f32 %v224_v44, %v240_v58  ;;  %v234_v9 = vpack.c.bf16 %v226_v2, %v226_v2 }
  0x2e   : > { %v241_v12 = vunpack.c.l.bf16 %v233_v8  ;;  %v211_v14 = vpack.c.bf16 %v648_v7, %v648_v7  ;;  %v212_v15 = vpack.c.bf16 %v650_v10, %v650_v10  ;;  %v270_v16 = vunpack.c.l.b16 %v233_v8 }
  0x2f   : > { %v274_v3 = vpack.c.b16 %v267_v62, %v266_v59  ;;  %572 = vmatmul.msk.bf16.vlgmr.msra.gmra.mxu3 %vm278_vm1, %v275_v63  ;;  %v254_v4 = vpack.c.bf16 %v248_v0, %v247_v60  ;;  %v242_v13 = vunpack.c.l.bf16 %v234_v9  ;;  %v271_v17 = vunpack.c.l.b16 %v234_v9 }
  0x30   : > { %v333_v19 = vunpack.c.l.b16 %v206_v36  ;;  %v249_v20 = vsub.f32 %v225_v61, %v241_v12  ;;  %v219_v22 = vunpack.c.l.bf16 %v211_v14  ;;  %v220_v23 = vunpack.c.l.bf16 %v212_v15 }
  0x31   : > { %571 = vmatmul.msk.bf16.vlgmr.msra.gmra.mxu0 %vm278_vm1, %v274_v3  ;;  %580 = vmatmul.msk.bf16.vlgmr.msra.gmra.mxu2 %vm278_vm1, %v254_v4  ;;  %v250_v21 = vsub.f32 %v226_v2, %v242_v13  ;;  %v276_v24 = vpack.c.b16 %v271_v17, %v270_v16  ;;  %v338_v28 = vunpack.c.l.b16 %v211_v14  ;;  %v339_v29 = vunpack.c.l.b16 %v212_v15 }
  0x32   : > { %404 = vmatpush.bf16.msra.mxu0 %v805_v1  ;;  %v340_v25 = vpack.c.b16 %v333_v19, %v332_v18  ;;  %v227_v1 = vsub.f32 %v648_v7, %v219_v22  ;;  %v228_v27 = vsub.f32 %v650_v10, %v220_v23  ;;  %v237_v32 = vunpack.c.l.bf16 %v229_v53 }
  0x33   : > { %v255_v26 = vpack.c.bf16 %v250_v21, %v249_v20  ;;  %v238_v33 = vunpack.c.l.bf16 %v230_v56  ;;  %v343_v34 = vpack.c.b16 %v339_v29, %v338_v28  ;;  %v851_v56 = vld [vmem:[%s917_s2 + $0x1] ss:$0 sm:$0xff] }
  0x34   : > { %v235_v30 = vpack.c.bf16 %v227_v1, %v227_v1  ;;  %v236_v31 = vpack.c.bf16 %v228_v27, %v228_v27  ;;  %v245_v39 = vsub.f32 %v818_v46, %v237_v32 }
  0x35   : > { %v246_v40 = vsub.f32 %v821_v50, %v238_v33  ;;  %v845_v50 = vld [vmem:[%s917_s2] ss:$0 sm:$0xff] }
  0x36   : > { %v243_v35 = vunpack.c.l.bf16 %v235_v30  ;;  %v244_v36 = vunpack.c.l.bf16 %v236_v31  ;;  %v272_v37 = vunpack.c.l.b16 %v235_v30  ;;  %v273_v38 = vunpack.c.l.b16 %v236_v31 }
  0x37   : > { %v253_v44 = vpack.c.bf16 %v246_v40, %v245_v39 }
  0x38   : > { %v251_v41 = vsub.f32 %v227_v1, %v243_v35  ;;  %v252_v42 = vsub.f32 %v228_v27, %v244_v36  ;;  %v277_v43 = vpack.c.b16 %v273_v38, %v272_v37 }
  0x39   : > { %577 = vmatmul.msk.bf16.gmra.mxu1 %vm278_vm1, %v342_v11 }
  0x3a   : > { %v256_v45 = vpack.c.bf16 %v252_v42, %v251_v41 }
  0x3f   : > { %573 = vmatmul.msk.bf16.gmra.mxu3 %vm278_vm1, %v276_v24 }
  0x41   : > { %575 = vmatmul.msk.bf16.vlgmr.msrb.gmra.mxu0 %vm278_vm1, %v340_v25  ;;  %581 = vmatmul.msk.bf16.gmra.mxu2 %vm278_vm1, %v255_v26 }
  0x49   : > { %578 = vmatmul.msk.bf16.gmra.mxu1 %vm278_vm1, %v343_v34 }
  0x4f   : > { %574 = vmatmul.msk.bf16.gmra.mxu3 %vm278_vm1, %v277_v43 }
  0x51   : > { %579 = vmatmul.msk.bf16.vlgmr.msra.gmra.mxu0 %vm278_vm1, %v253_v44  ;;  %582 = vmatmul.msk.bf16.gmra.mxu2 %vm278_vm1, %v256_v45 }
  0xa6   : > { %v370_v47 = vpop.f32.mrf.mxu1 }
  0xae   : > { %v304_v48 = vpop.f32.mrf.mxu0  ;;  %v372_v46 = vpop.f32.mrf.mxu1 }
  0xb2   : > { %v309_v49 = vpop.f32.mrf.mxu3 }
  0xb3   : > { %v371_v51 = vadd.f32 %v370_v47, %v309_v49 }
  0xb4   : > { %v411_v52 = vpop.f32.mrf.mxu2 }
  0xb5   : > { %v428_v53 = vadd.f32 %v411_v52, %v371_v51 }
  0xb6   : > { %v306_v54 = vpop.f32.mrf.mxu0  ;;  %v375_v61 = vpop.f32.mrf.mxu1 }
  0xb7   : > { %v439_v55 = vsub.f32 %v428_v53, %v845_v50 }
  0xb9   : > { %v447_v57 = vmul.f32 %v439_v55, %v439_v55 }
  0xba   : > { %v311_v58 = vpop.f32.mrf.mxu3 }
  0xbb   : > { %v456_v59 = vmul.f32 %v851_v56, %v447_v57  ;;  %v373_v60 = vadd.f32 %v372_v46, %v311_v58 }
  0xbc   : > { %v413_v62 = vpop.f32.mrf.mxu2 }
  0xbd   : > { %v466_v63 = vmul.f32 1.442695, %v456_v59  ;;  %v429_v0 = vadd.f32 %v413_v62, %v373_v60 }
  0xbe   : > { %v365_v2 = vpop.f32.mrf.mxu0  ;;  %v377_v12 = vpop.f32.mrf.mxu1 }
  0xbf   : > { %651 = vpow2.f32 %v466_v63  ;;  %v440_v3 = vsub.f32 %v429_v0, %v845_v50  ;;  %v366_v21 = vadd.f32 %v365_v2, %v304_v48 }
  0xc1   : > { %v448_v4 = vmul.f32 %v440_v3, %v440_v3 }
  0xc2   : > { %v314_v5 = vpop.f32.mrf.mxu3 }
  0xc3   : > { %v457_v6 = vmul.f32 %v851_v56, %v448_v4  ;;  %v376_v7 = vadd.f32 %v375_v61, %v314_v5 }
  0xc4   : > { %v416_v8 = vpop.f32.mrf.mxu2 }
  0xc5   : > { %v652_v9 = vpop.eup %651  ;;  %v468_v10 = vmul.f32 1.442695, %v457_v6  ;;  %v430_v11 = vadd.f32 %v416_v8, %v376_v7 }
  0xc6   : > { %480 = vst [vmem:[%s859_s10 + $0x10] sm:$0xff] %v652_v9  ;;  %v367_v13 = vpop.f32.mrf.mxu0  ;;  %v380_v1 = vpop.f32.mrf.mxu1 }
  0xc7   : > { %653 = vpow2.f32 %v468_v10  ;;  %v441_v14 = vsub.f32 %v430_v11, %v845_v50  ;;  %v368_v35 = vadd.f32 %v367_v13, %v306_v54 }
  0xc9   : > { %v449_v15 = vmul.f32 %v441_v14, %v441_v14 }
  0xca   : > { %v316_v16 = vpop.f32.mrf.mxu3 }
  0xcb   : > { %v458_v17 = vmul.f32 %v851_v56, %v449_v15  ;;  %v378_v18 = vadd.f32 %v377_v12, %v316_v16 }
  0xcc   : > { %v418_v19 = vpop.f32.mrf.mxu2 }
  0xcd   : > { %v654_v20 = vpop.eup %653  ;;  %v470_v22 = vmul.f32 1.442695, %v458_v17  ;;  %v431_v23 = vadd.f32 %v418_v19, %v378_v18 }
  0xce   : > { %481 = vst [vmem:[%s859_s10 + $0x18] sm:$0xff] %v654_v20  ;;  %v406_v24 = vpop.f32.mrf.mxu0  ;;  %v382_v45 = vpop.f32.mrf.mxu1 }
  0xcf   : > { %655 = vpow2.f32 %v470_v22  ;;  %v426_v25 = vadd.f32 %v406_v24, %v366_v21  ;;  %v442_v26 = vsub.f32 %v431_v23, %v845_v50 }
  0xd1   : > { %v437_v27 = vsub.f32 %v426_v25, %v845_v50  ;;  %v450_v28 = vmul.f32 %v442_v26, %v442_v26 }
  0xd2   : > { %v319_v29 = vpop.f32.mrf.mxu3 }
  0xd3   : > { %v445_v30 = vmul.f32 %v437_v27, %v437_v27  ;;  %v459_v31 = vmul.f32 %v851_v56, %v450_v28  ;;  %v381_v32 = vadd.f32 %v380_v1, %v319_v29 }
  0xd4   : > { %v421_v33 = vpop.f32.mrf.mxu2 }
  0xd5   : > { %v656_v34 = vpop.eup %655  ;;  %v454_v36 = vmul.f32 %v851_v56, %v445_v30  ;;  %v472_v37 = vmul.f32 1.442695, %v459_v31  ;;  %v432_v38 = vadd.f32 %v421_v33, %v381_v32 }
  0xd6   : > { %482 = vst [vmem:[%s859_s10 + $0x20] sm:$0xff] %v656_v34  ;;  %v408_v39 = vpop.f32.mrf.mxu0 }
  0xd7   : > { %v462_v40 = vmul.f32 1.442695, %v454_v36  ;;  %657 = vpow2.f32 %v472_v37  ;;  %v427_v41 = vadd.f32 %v408_v39, %v368_v35  ;;  %v443_v42 = vsub.f32 %v432_v38, %v845_v50 }
  0xd9   : > { %659 = vpow2.f32 %v462_v40  ;;  %v438_v43 = vsub.f32 %v427_v41, %v845_v50  ;;  %v451_v44 = vmul.f32 %v443_v42, %v443_v42 }
  0xda   : > { %v321_v47 = vpop.f32.mrf.mxu3 }
  0xdb   : > { %v446_v48 = vmul.f32 %v438_v43, %v438_v43  ;;  %v460_v49 = vmul.f32 %v851_v56, %v451_v44  ;;  %v383_v46 = vadd.f32 %v382_v45, %v321_v47 }
  0xdc   : > { %v423_v51 = vpop.f32.mrf.mxu2 }
  0xdd   : > { %v658_v52 = vpop.eup %657  ;;  %v455_v53 = vmul.f32 %v851_v56, %v446_v48  ;;  %v474_v54 = vmul.f32 1.442695, %v460_v49  ;;  %v433_v55 = vadd.f32 %v423_v51, %v383_v46 }
  0xde   : > { %483 = vst [vmem:[%s859_s10 + $0x28] sm:$0xff] %v658_v52 }
  0xdf   : > { %v660_v57 = vpop.eup %659  ;;  %v464_v58 = vmul.f32 1.442695, %v455_v53  ;;  %661 = vpow2.f32 %v474_v54  ;;  %v444_v59 = vsub.f32 %v433_v55, %v845_v50 }
  0xe0   : > { %478 = vst [vmem:[%s859_s10] sm:$0xff] %v660_v57 }
  0xe1   : > { %663 = vpow2.f32 %v464_v58  ;;  %v452_v60 = vmul.f32 %v444_v59, %v444_v59 }
  0xe3   : > { %v461_v61 = vmul.f32 %v851_v56, %v452_v60 }
  0xe5   : > { %v662_v62 = vpop.eup %661  ;;  %v476_v63 = vmul.f32 1.442695, %v461_v61 }
  0xe6   : > { %484 = vst [vmem:[%s859_s10 + $0x30] sm:$0xff] %v662_v62 }
  0xe7   : > { %v664_v0 = vpop.eup %663  ;;  %665 = vpow2.f32 %v476_v63 }
  0xe8   : > { %479 = vst [vmem:[%s859_s10 + $0x8] sm:$0xff] %v664_v0 }
  0xed   : > { %v666_v50 = vpop.eup %665 }
  0xee   : > { %485 = vst [vmem:[%s859_s10 + $0x38] sm:$0xff] %v666_v50 }
  0xef   : > { %694 = shalt.err (!%p691_p3)
}
  0xf0   : > { %s731_s6 = smov 128   ;;  %s732_s7 = smov 8  }
  0xf1   : > { %592 = dma.vmem_to_hbm [thread:$0]  (%p791_p5), %s500_s24, 1024, %s502_s25, %s487_s16, %s731_s6, %s731_s6, %s732_s7  }
  0xf2 PF: > { %p598_p4 = scmp.ge.s32.totalorder %s729_s15, 2  ;;  %s516_s8 = sand.u32 1, %s717_s12  }
  0xf3   : > { %s517_s9 = scalar_lea.sflag [#allocation3], %s516_s8 }
  0xf4   : > { %p595_p7 = pnand %p598_p4, %p795_p6 }
  0xf6   : > { %p596_p8 = pneg %p595_p7 }
  0xf8   : > { %712 = dma.done.wait (%p596_p8), %s517_s9, 1024  }
  0xf9   : > { %714 = vsyncadd (%p596_p8), %s517_s9, 4294966272  ;;  %p13_p9 = scmp.ge.s32.totalorder %s778_s18, 10   ;;  %s921_s12 = smov %s721_s13 }
  0xfa   : > { %s922_s13 = smov %s725_s14  ;;  %s923_s14 = smov %s789_s21 }
  0xfb   : > { %s924_s15 = smov %s778_s18  ;;  %15 = sbr.rel (!%p13_p9) target bundleno = 3 (0x3), region = 67 }
 0x100   :  { %523 = vsyncpa [#allocation3], 1 }
 0x101   :  { %525 = vsyncpa [#allocation3 + $0x1], 1 }

</bundles_post_ra>
